<compile_context>
chip_gen: v5e
topology: v5e:2x2
jax: 0.10.0
libtpu: 0.0.40
codegen_flags: <defaults>
</compile_context>

<pallas_src>
import jax
import jax.numpy as jnp
from jax.experimental import pallas as pl
from jax.experimental.pallas import tpu as pltpu


def critic_mlp_kernel(x_ref, w1_ref, b1_ref, w2_ref, b2_ref, w3_ref, b3_ref,
                      o_ref):
    """One batch tile of the 3-layer critic MLP, feature-major layout.

    x_ref:  (IN, TB)  concatenated [state; action] columns (batch on lanes)
    w1_ref: (32, IN)  b1_ref: (32, 1)
    w2_ref: (16, 32)  b2_ref: (16, 1)
    w3_ref: (16, 1)   b3_ref: (1, 1)
    o_ref:  (1, TB)   lane-dense Q-values for this tile
    """
    x = x_ref[...]

    # Layer 1: (32, IN) @ (IN, TB) on the MXU, bias splat along lanes, ReLU.
    h1 = jnp.dot(w1_ref[...], x, preferred_element_type=jnp.float32)
    h1 = jnp.maximum(h1 + b1_ref[...], 0.0)

    # Layer 2: (16, 32) @ (32, TB) on the MXU.
    h2 = jnp.dot(w2_ref[...], h1, preferred_element_type=jnp.float32)
    h2 = jnp.maximum(h2 + b2_ref[...], 0.0)

    # Layer 3 (16 -> 1): VPU multiply by the (16,1) weight column + XLU
    # cross-sublane reduce -> lane-dense (1, TB).  No N=1 MXU pass, no
    # transpose (h2 is already feature-major), no masked column stores.
    q = jnp.sum(w3_ref[...] * h2, axis=0, keepdims=True) + b3_ref[...]
    o_ref[...] = q.astype(o_ref.dtype)


def _cdiv(a, b):
    return -(-a // b)


def _round_up(x, m):
    return _cdiv(x, m) * m


def critic_forward(state, actions, params, *, block_cols=4096):
    """Q(s, a) for a batch. state: (B, S), actions: (B, A) -> (B, 1)."""
    w1, b1, w2, b2, w3t, b3 = params
    B = state.shape[0]

    # Single feature-major input stream: (IN, B) with batch on the lane axis.
    # Wrapper-side transpose+concat of a (B, 4) array is negligible HBM traffic.
    x_t = jnp.concatenate(
        [state.astype(jnp.float32).T, actions.astype(jnp.float32).T], axis=0)
    in_dim = x_t.shape[0]

    # Tile the batch (lane) axis.  Balance tile size across blocks to minimize
    # tail padding; keep tb a multiple of 128 (lane-dense tiles/stores).  Bump
    # the block count to even when >1 so v7x's 2 TensorCores split the
    # "parallel" axis evenly (harmless on single-TC v5e/v6e).
    num_blocks = max(1, _cdiv(B, block_cols))
    if num_blocks > 1 and num_blocks % 2:
        num_blocks += 1
    tb = _round_up(_cdiv(B, num_blocks), 128)
    b_padded = num_blocks * tb
    if b_padded != B:
        x_t = jnp.pad(x_t, ((0, 0), (0, b_padded - B)))

    def resident(shape):
        # Full-array block, constant index_map: fetched once, stays in VMEM.
        return pl.BlockSpec(shape, lambda i: (0,) * len(shape))

    out = pl.pallas_call(
        critic_mlp_kernel,
        out_shape=jax.ShapeDtypeStruct((1, b_padded), jnp.float32),
        grid=(num_blocks,),
        in_specs=[
            pl.BlockSpec((in_dim, tb), lambda i: (0, i)),   # input stream
            resident(w1.shape), resident(b1.shape),
            resident(w2.shape), resident(b2.shape),
            resident(w3t.shape), resident(b3.shape),
        ],
        out_specs=pl.BlockSpec((1, tb), lambda i: (0, i)),   # lane-dense row
        compiler_params=pltpu.CompilerParams(
            dimension_semantics=("parallel",)),
    )(x_t, w1, b1, w2, b2, w3t, b3)

    # (1, b_padded) -> (B, 1); padded tail columns are sliced off.
    return out[0, :B][:, None]


def init_params(key, state_dim, action_dim):
    """PyTorch nn.Linear-style init.  Weights kept in PyTorch's (out, in)
    layout (what the feature-major kernel wants directly); biases as (out, 1);
    the last layer's weight is pre-transposed once to a (16, 1) column."""
    input_size = state_dim + action_dim

    def linear_init(k, fan_in, fan_out):
        kw, kb = jax.random.split(k)
        bound = float(fan_in) ** -0.5
        w = jax.random.uniform(kw, (fan_out, fan_in), jnp.float32, -bound, bound)
        b = jax.random.uniform(kb, (fan_out, 1), jnp.float32, -bound, bound)
        return w, b

    k1, k2, k3 = jax.random.split(key, 3)
    w1, b1 = linear_init(k1, input_size, 32)
    w2, b2 = linear_init(k2, 32, 16)
    w3, b3 = linear_init(k3, 16, 1)
    return (w1, b1, w2, b2, w3.T, b3)       # w3.T: (16, 1) column


def reference_forward(state, actions, params):
    """Pure-JAX reference for correctness check."""
    w1, b1, w2, b2, w3t, b3 = params
    x = jnp.concatenate([state, actions], axis=-1).astype(jnp.float32)
    h1 = jnp.maximum(x @ w1.T + b1[:, 0], 0.0)
    h2 = jnp.maximum(h1 @ w2.T + b2[:, 0], 0.0)
    return h2 @ w3t + b3[:, 0]


if __name__ == "__main__":
    key = jax.random.PRNGKey(0)
    k_params, k_state, k_action = jax.random.split(key, 3)

    # Pendulum: state dim 3, action dim 1 -> input_size = 4; small batch of 8.
    batch, state_dim, action_dim = 8, 3, 1
    params = init_params(k_params, state_dim, action_dim)
    state = jax.random.normal(k_state, (batch, state_dim), jnp.float32)
    actions = jax.random.normal(k_action, (batch, action_dim), jnp.float32)

    out = jax.block_until_ready(critic_forward(state, actions, params))
    ref = reference_forward(state, actions, params)
    assert out.shape == (batch, 1), out.shape
    assert jnp.allclose(out, ref, atol=1e-4, rtol=1e-4), (out, ref)

    # Exercise the tiled/pipelined path: multi-block grid with a ragged tail.
    k2s, k2a = jax.random.split(jax.random.PRNGKey(1))
    big_batch = 1037
    state2 = jax.random.normal(k2s, (big_batch, state_dim), jnp.float32)
    actions2 = jax.random.normal(k2a, (big_batch, action_dim), jnp.float32)
    out2 = jax.block_until_ready(
        critic_forward(state2, actions2, params, block_cols=256))
    ref2 = reference_forward(state2, actions2, params)
    assert out2.shape == (big_batch, 1), out2.shape
    assert jnp.allclose(out2, ref2, atol=1e-4, rtol=1e-4), "large-batch mismatch"

    print("KERNEL_OK")
</pallas_src>

<mosaic_0001>
module attributes {stable_mosaic.version = 11 : i64} {
  func.func @critic_mlp_kernel(%arg0: i32, %arg1: memref<4x128xf32, #tpu.memory_space<vmem>>, %arg2: memref<32x4xf32, #tpu.memory_space<vmem>>, %arg3: memref<32x1xf32, #tpu.memory_space<vmem>>, %arg4: memref<16x32xf32, #tpu.memory_space<vmem>>, %arg5: memref<16x1xf32, #tpu.memory_space<vmem>>, %arg6: memref<16x1xf32, #tpu.memory_space<vmem>>, %arg7: memref<1x1xf32, #tpu.memory_space<vmem>>, %arg8: memref<1x128xf32, #tpu.memory_space<vmem>>) attributes {dimension_semantics = [#tpu.dimension_semantics<parallel>], iteration_bounds = array<i64: 1>, scalar_prefetch = 0 : i64, scratch_operands = 0 : i64, tpu.core_type = #tpu.core_type<tc>, window_params = [{transform_indices = @transform_0, window_bounds = array<i64: 4, 128>}, {pipeline_mode = #tpu.pipeline_mode<synchronous>, transform_indices = @transform_1, window_bounds = array<i64: 32, 4>}, {pipeline_mode = #tpu.pipeline_mode<synchronous>, transform_indices = @transform_2, window_bounds = array<i64: 32, 1>}, {pipeline_mode = #tpu.pipeline_mode<synchronous>, transform_indices = @transform_3, window_bounds = array<i64: 16, 32>}, {pipeline_mode = #tpu.pipeline_mode<synchronous>, transform_indices = @transform_4, window_bounds = array<i64: 16, 1>}, {pipeline_mode = #tpu.pipeline_mode<synchronous>, transform_indices = @transform_5, window_bounds = array<i64: 16, 1>}, {pipeline_mode = #tpu.pipeline_mode<synchronous>, transform_indices = @transform_6, window_bounds = array<i64: 1, 1>}, {transform_indices = @transform_7, window_bounds = array<i64: 1, 128>}]} {
    %c0 = arith.constant 0 : index
    %c0_0 = arith.constant 0 : index
    %0 = vector.load %arg1[%c0, %c0_0] : memref<4x128xf32, #tpu.memory_space<vmem>>, vector<4x128xf32>
    %c0_1 = arith.constant 0 : index
    %c0_2 = arith.constant 0 : index
    %1 = vector.load %arg2[%c0_1, %c0_2] : memref<32x4xf32, #tpu.memory_space<vmem>>, vector<32x4xf32>
    %cst = arith.constant dense<0.000000e+00> : vector<32x128xf32>
    %2 = tpu.matmul %1, %0, %cst {dimension_numbers = #tpu.dot_dimension_numbers<[1], [0], [0], [1], [0, 0, 1, 1], [], []>} : vector<32x4xf32>, vector<4x128xf32>, vector<32x128xf32> -> vector<32x128xf32>
    %c0_3 = arith.constant 0 : index
    %c0_4 = arith.constant 0 : index
    %3 = vector.load %arg3[%c0_3, %c0_4] : memref<32x1xf32, #tpu.memory_space<vmem>>, vector<32x1xf32>
    %4 = vector.broadcast %3 : vector<32x1xf32> to vector<32x128xf32>
    %5 = arith.addf %2, %4 : vector<32x128xf32>
    %cst_5 = arith.constant 0.000000e+00 : f32
    %6 = vector.broadcast %cst_5 : f32 to vector<32x128xf32>
    %7 = arith.maximumf %5, %6 : vector<32x128xf32>
    %c0_6 = arith.constant 0 : index
    %c0_7 = arith.constant 0 : index
    %8 = vector.load %arg4[%c0_6, %c0_7] : memref<16x32xf32, #tpu.memory_space<vmem>>, vector<16x32xf32>
    %cst_8 = arith.constant dense<0.000000e+00> : vector<16x128xf32>
    %9 = tpu.matmul %8, %7, %cst_8 {dimension_numbers = #tpu.dot_dimension_numbers<[1], [0], [0], [1], [0, 0, 1, 1], [], []>} : vector<16x32xf32>, vector<32x128xf32>, vector<16x128xf32> -> vector<16x128xf32>
    %c0_9 = arith.constant 0 : index
    %c0_10 = arith.constant 0 : index
    %10 = vector.load %arg5[%c0_9, %c0_10] : memref<16x1xf32, #tpu.memory_space<vmem>>, vector<16x1xf32>
    %11 = vector.broadcast %10 : vector<16x1xf32> to vector<16x128xf32>
    %12 = arith.addf %9, %11 : vector<16x128xf32>
    %cst_11 = arith.constant 0.000000e+00 : f32
    %13 = vector.broadcast %cst_11 : f32 to vector<16x128xf32>
    %14 = arith.maximumf %12, %13 : vector<16x128xf32>
    %c0_12 = arith.constant 0 : index
    %c0_13 = arith.constant 0 : index
    %15 = vector.load %arg6[%c0_12, %c0_13] : memref<16x1xf32, #tpu.memory_space<vmem>>, vector<16x1xf32>
    %16 = vector.broadcast %15 : vector<16x1xf32> to vector<16x128xf32>
    %17 = arith.mulf %16, %14 : vector<16x128xf32>
    %cst_14 = arith.constant dense<0.000000e+00> : vector<128xf32>
    %18 = vector.multi_reduction <add>, %17, %cst_14 [0] : vector<16x128xf32> to vector<128xf32>
    %19 = vector.shape_cast %18 : vector<128xf32> to vector<1x128xf32>
    %c0_15 = arith.constant 0 : index
    %c0_16 = arith.constant 0 : index
    %20 = vector.load %arg7[%c0_15, %c0_16] : memref<1x1xf32, #tpu.memory_space<vmem>>, vector<1x1xf32>
    %21 = vector.broadcast %20 : vector<1x1xf32> to vector<1x128xf32>
    %22 = arith.addf %19, %21 : vector<1x128xf32>
    %c0_17 = arith.constant 0 : index
    %c0_18 = arith.constant 0 : index
    %23 = vector.load %arg8[%c0_17, %c0_18] : memref<1x128xf32, #tpu.memory_space<vmem>>, vector<1x128xf32>
    tpu.vector_store %arg8[%c0_17, %c0_18], %22 {strides = array<i32>} : memref<1x128xf32, #tpu.memory_space<vmem>>, vector<1x128xf32>,
    return
  }
  func.func @transform_0(%arg0: i32) -> (i32, i32) {
    %c0_i32 = arith.constant 0 : i32
    %c0_i32_0 = arith.constant 0 : i32
    return %c0_i32, %arg0 : i32, i32
  }
  func.func @transform_1(%arg0: i32) -> (i32, i32) {
    %c0_i32 = arith.constant 0 : i32
    %c0_i32_0 = arith.constant 0 : i32
    %c0_i32_1 = arith.constant 0 : i32
    return %c0_i32, %c0_i32_0 : i32, i32
  }
  func.func @transform_2(%arg0: i32) -> (i32, i32) {
    %c0_i32 = arith.constant 0 : i32
    %c0_i32_0 = arith.constant 0 : i32
    %c0_i32_1 = arith.constant 0 : i32
    return %c0_i32, %c0_i32_0 : i32, i32
  }
  func.func @transform_3(%arg0: i32) -> (i32, i32) {
    %c0_i32 = arith.constant 0 : i32
    %c0_i32_0 = arith.constant 0 : i32
    %c0_i32_1 = arith.constant 0 : i32
    return %c0_i32, %c0_i32_0 : i32, i32
  }
  func.func @transform_4(%arg0: i32) -> (i32, i32) {
    %c0_i32 = arith.constant 0 : i32
    %c0_i32_0 = arith.constant 0 : i32
    %c0_i32_1 = arith.constant 0 : i32
    return %c0_i32, %c0_i32_0 : i32, i32
  }
  func.func @transform_5(%arg0: i32) -> (i32, i32) {
    %c0_i32 = arith.constant 0 : i32
    %c0_i32_0 = arith.constant 0 : i32
    %c0_i32_1 = arith.constant 0 : i32
    return %c0_i32, %c0_i32_0 : i32, i32
  }
  func.func @transform_6(%arg0: i32) -> (i32, i32) {
    %c0_i32 = arith.constant 0 : i32
    %c0_i32_0 = arith.constant 0 : i32
    %c0_i32_1 = arith.constant 0 : i32
    return %c0_i32, %c0_i32_0 : i32, i32
  }
  func.func @transform_7(%arg0: i32) -> (i32, i32) {
    %c0_i32 = arith.constant 0 : i32
    %c0_i32_0 = arith.constant 0 : i32
    return %c0_i32, %arg0 : i32, i32
  }
}

</mosaic_0001>

<bundles_post_ra>
// kernel: tpu_custom_call.1
= control target key start
LH: loop header
LB: loop body
LE: loop exit
PB: predicated region body
PF: predicated region fallthrough
CT: control target
= control target key end

     0   :  { %s340_s0 = inlined_call_operand.vmem [shape: f32[4,128], index: 0, kind: input, shape index: {}]   ;;  %s341_s1 = inlined_call_operand.vmem [shape: f32[32,4], index: 1, kind: input, shape index: {}]   ;;  %s342_s2 = inlined_call_operand.vmem [shape: f32[32,1], index: 2, kind: input, shape index: {}]   ;;  %s343_s3 = inlined_call_operand.vmem [shape: f32[16,32], index: 3, kind: input, shape index: {}]   ;;  %s344_s4 = inlined_call_operand.vmem [shape: f32[16,1], index: 4, kind: input, shape index: {}]   ;;  %s345_s5 = inlined_call_operand.vmem [shape: f32[16,1], index: 5, kind: input, shape index: {}]   ;;  %s346_s6 = inlined_call_operand.<no memory space> [shape: f32[1,1], index: 6, kind: input, shape index: {}]   ;;  %s347_s7 = inlined_call_operand.hbm [shape: f32[1,128], index: 7, kind: output, shape index: {}]  }
   0x1   :  { %v12_v0 = vstv %s346_s6 }
   0x2   :  { %13 = vst [vmem:[#allocation2] sm:$0x1] %v12_v0 }
   0x3   :  { %v29_v1 = vld [vmem:[%s340_s0] sm:$0xf]  ;;  %vm71_vm0 = vcmask 1043456   ;;  %v32_v2 = vld [vmem:[%s341_s1 + $0x10] sm:$0xff]  ;;  %vm58_vm1 = vcmask 31744   ;;  %v243_v3 = vmov 0  }
   0x4   :  { %207 = vmatpush.msk.msra.mxu2 %vm71_vm0, %v29_v1  ;;  %214 = vset.pattern.permute.xlu0 %v243_v3  ;;  %v37_v4 = vld [vmem:[%s342_s2 + $0x18] sm:$0xff]  ;;  %v30_v5 = vld [vmem:[%s341_s1] sm:$0xff]  ;;  %v35_v6 = vld [vmem:[%s342_s2 + $0x8] sm:$0xff] }
   0x5   :  { %203 = vmatmul.msk.f32.vlgmr.msra.gmra.mxu2 %vm58_vm1, %v32_v2  ;;  %55 = vperm.xlu0 %214, %v37_v4  }
   0x6   :  { %200 = vmatpush.msk.msra.mxu0 %vm71_vm0, %v29_v1  ;;  %215 = vset.pattern.permute.xlu1 %v243_v3 }
   0x7   :  { %201 = vmatmul.msk.f32.vlgmr.msra.gmra.mxu0 %vm58_vm1, %v30_v5  ;;  %45 = vperm.xlu1 %215, %v35_v6  }
   0x8   :  { %14 = vsyncpa [#allocation4], 0  ;;  %216 = vset.pattern.permute.xlu2 %v243_v3  ;;  %v33_v7 = vld [vmem:[%s341_s1 + $0x18] sm:$0xff]  ;;  %v36_v8 = vld [vmem:[%s342_s2 + $0x10] sm:$0xff]  ;;  %vm122_vm2 = vcmask 261120   ;;  %s191_s30 = sshll.u32 %s347_s7, 4  ;;  %s192_s30 = int_to_ptr.hbm [resolvable:$true] %s191_s30 }
   0x9   :  { %v31_v9 = vld [vmem:[%s341_s1 + $0x8] sm:$0xff]  ;;  %v34_v10 = vld [vmem:[%s342_s2] sm:$0xff] }
   0xa   :  { %v154_v11 = vld [vmem:[%s345_s5] sm:$0xff]  ;;  %v155_v12 = vld [vmem:[%s345_s5 + $0x8] sm:$0xff] }
   0xb   :  { %v110_v13 = vld [vmem:[%s344_s4] sm:$0xff]  ;;  %v111_v14 = vld [vmem:[%s344_s4 + $0x8] sm:$0xff] }
   0xc   :  { %114 = vperm.xlu2 %216, %v110_v13   ;;  %v175_v19 = vld [vmem:[#allocation2] sm:$0x1]  ;;  %v109_v33 = vld [vmem:[%s343_s3 + $0x8] sm:$0xff] }
   0xd   :  { %204 = vmatmul.msk.f32.gmra.mxu2 %vm58_vm1, %v33_v7  ;;  %50 = vperm.xlu0 %214, %v36_v8   ;;  %v108_v32 = vld [vmem:[%s343_s3] sm:$0xff]  ;;  %s244_s3 = smov [#allocation3]  }
   0xe   :  { %s189_s27 = sshll.u32 %s244_s3, 4  ;;  %s190_s27 = int_to_ptr.vmem [resolvable:$true] %s189_s27 }
   0xf   :  { %202 = vmatmul.msk.f32.gmra.mxu0 %vm58_vm1, %v31_v9  ;;  %40 = vperm.xlu1 %215, %v34_v10  }
  0x14   :  { %119 = vperm.xlu2 %216, %v111_v14  }
  0x15   :  { %158 = vperm.xlu0 %214, %v154_v11  }
  0x17   :  { %163 = vperm.xlu1 %215, %v155_v12  }
  0x1c   :  { %178 = vperm.xlu2 %216, %v175_v19  }
  0x66   :  { %v115_v34 = vpop.permute.xlu2 %114 }
  0x6e   :  { %v120_v37 = vpop.permute.xlu2 %119 }
  0x76   :  { %v179_v51 = vpop.permute.xlu2 %178 }
  0x77   :  { %v56_v15 = vpop.permute.xlu0 %55  ;;  %v181_v53 = vperm.slane %v179_v51, 0 }
  0x79   :  { %v46_v18 = vpop.permute.xlu1 %45 }
  0x7f   :  { %v51_v20 = vpop.permute.xlu0 %50 }
  0x81   :  { %v41_v27 = vpop.permute.xlu1 %40 }
  0x84   :  { %v92_v16 = vpop.f32.mrf.mxu0 }
  0x85   :  { %v93_v28 = vadd.f32 %v92_v16, %v41_v27 }
  0x87   :  { %v104_v31 = vmax.f32 %v93_v28, 0.0  ;;  %v159_v42 = vpop.permute.xlu0 %158 }
  0x88   :  { %v98_v17 = vpop.f32.mrf.mxu2 }
  0x89   :  { %v99_v23 = vadd.f32 %v98_v17, %v51_v20  ;;  %v164_v43 = vpop.permute.xlu1 %163 }
  0x8b   :  { %v106_v29 = vmax.f32 %v99_v23, 0.0 }
  0x8c   :  { %v95_v21 = vpop.f32.mrf.mxu0 }
  0x8d   :  { %v96_v25 = vadd.f32 %v95_v21, %v46_v18 }
  0x8f   :  { %v105_v30 = vmax.f32 %v96_v25, 0.0 }
  0x90   :  { %v101_v22 = vpop.f32.mrf.mxu2 }
  0x91   :  { %v102_v24 = vadd.f32 %v101_v22, %v56_v15 }
  0x93   :  { %v107_v26 = vmax.f32 %v102_v24, 0.0 }
  0x95   :  { %141 = vmatpush.msra.mxu1 %v107_v26  ;;  %208 = vmatpush.msra.mxu3 %v107_v26 }
  0x97   :  { %142 = vmatpush.msra.mxu1 %v106_v29  ;;  %209 = vmatpush.msra.mxu3 %v106_v29 }
  0x99   :  { %143 = vmatpush.msra.mxu1 %v105_v30  ;;  %210 = vmatpush.msra.mxu3 %v105_v30 }
  0x9b   :  { %144 = vmatpush.msra.mxu1 %v104_v31  ;;  %211 = vmatpush.msra.mxu3 %v104_v31 }
  0x9c   :  { %205 = vmatmul.msk.f32.vlgmr.msra.gmra.mxu1 %vm122_vm2, %v108_v32  ;;  %206 = vmatmul.msk.f32.vlgmr.msra.gmra.mxu3 %vm122_vm2, %v109_v33 }
 0x119   :  { %v146_v35 = vpop.f32.mrf.mxu1 }
 0x11a   :  { %v147_v36 = vadd.f32 %v146_v35, %v115_v34 }
 0x11c   :  { %v152_v39 = vmax.f32 %v147_v36, 0.0 }
 0x11e   :  { %v166_v44 = vmul.f32 %v159_v42, %v152_v39 }
 0x11f   :  { %v149_v38 = vpop.f32.mrf.mxu3 }
 0x120   :  { %v150_v40 = vadd.f32 %v149_v38, %v120_v37 }
 0x122   :  { %v153_v41 = vmax.f32 %v150_v40, 0.0 }
 0x124   :  { %v167_v45 = vmul.f32 %v164_v43, %v153_v41 }
 0x126   :  { %v168_v46 = vadd.f32 %v167_v45, %v166_v44 }
 0x128   :  { %v169_v47 = vrot.slane %v168_v46, 4 }
 0x12a   :  { %v170_v48 = vadd.f32 %v169_v47, %v168_v46 }
 0x12c   :  { %v171_v49 = vrot.slane %v170_v48, 2 }
 0x12e   :  { %v172_v50 = vadd.f32 %v171_v49, %v170_v48 }
 0x130   :  { %v173_v52 = vrot.slane %v172_v50, 1 }
 0x132   :  { %v174_v54 = vadd.f32 %v173_v52, %v172_v50 }
 0x134   :  { %v182_v55 = vadd.f32 %v181_v53, %v174_v54 }
 0x136   :  { %183 = vst [vmem:[#allocation3] sm:$0x1] %v182_v55 }
 0x137   :  { %194 = dma.vmem_to_hbm [thread:$0]  %s190_s27, 16, %s192_s30, [#allocation4]  }
 0x138   :  { %241 = dma.done.wait [#allocation4], 16  }
 0x139   :  { %242 = vsyncadd [#allocation4], 4294967280 }
 0x13a   :  { %199 = vsyncpa [#allocation4], 1 }

</bundles_post_ra>
